<compile_context>
chip_gen: v7x
topology: tpu7x:2x2x1
jax: 0.10.0
libtpu: 0.0.40
codegen_flags: <defaults>
</compile_context>

<pallas_src>
import functools

import jax
import jax.numpy as jnp
from jax.experimental import pallas as pl
from jax.experimental.pallas import tpu as pltpu


# ------------------------------------------------------------------ kernels -


def _ensemble_yacc_kernel(x_ref, w_ref, b_ref, o_ref, y_acc_ref, *, inv_e):
    """Small/moderate-batch path: accumulate partial outputs in f32.

    grid = (D_out // tn, E // Et)
      x_ref : (B, D_in)        resident across the whole grid
      w_ref : (Et, D_in, tn)   streamed over the ensemble axis
      b_ref : (E, tn)          resident per output tile (full ensemble extent)
      o_ref : (B, tn)          written once, on the last ensemble step
      y_acc : (B, tn) f32      VMEM scratch
    """
    e = pl.program_id(1)
    n_e = pl.num_programs(1)          # static
    et = w_ref.shape[0]               # static

    x = x_ref[...]
    # Sum this block's Et member contributions on the MXU (f32 accumulation).
    partial = jnp.dot(x, w_ref[0], preferred_element_type=jnp.float32)
    for k in range(1, et):
        partial += jnp.dot(x, w_ref[k], preferred_element_type=jnp.float32)

    @pl.when(e == 0)
    def _init():                      # first step writes (no zero-init RMW)
        y_acc_ref[...] = partial

    @pl.when(e > 0)
    def _accumulate():
        y_acc_ref[...] += partial

    @pl.when(e == n_e - 1)
    def _finalize():
        b_sum = jnp.sum(b_ref[...].astype(jnp.float32), axis=0, keepdims=True)
        o_ref[...] = ((y_acc_ref[...] + b_sum) * inv_e).astype(o_ref.dtype)


def _ensemble_wavg_kernel(x_ref, w_ref, b_ref, o_ref, w_acc_ref, *, inv_e):
    """Large-batch path: sum the weights, do ONE matmul on the averaged model.

      w_acc : (D_in, tn) f32 VMEM scratch holding sum_e W_e for this out tile.
    """
    e = pl.program_id(1)
    n_e = pl.num_programs(1)

    w_blk = jnp.sum(w_ref[...].astype(jnp.float32), axis=0)   # (D_in, tn)

    @pl.when(e == 0)
    def _init():
        w_acc_ref[...] = w_blk

    @pl.when(e > 0)
    def _accumulate():
        w_acc_ref[...] += w_blk

    @pl.when(e == n_e - 1)
    def _finalize():
        b_sum = jnp.sum(b_ref[...].astype(jnp.float32), axis=0, keepdims=True)
        # One MXU matmul on the *summed* weights; scale by 1/E on the small
        # (B, tn) output instead of the (D_in, tn) slab.
        y = jnp.dot(x_ref[...], w_acc_ref[...].astype(x_ref.dtype),
                    preferred_element_type=jnp.float32)
        o_ref[...] = ((y + b_sum) * inv_e).astype(o_ref.dtype)


# ------------------------------------------------------------ tiling policy -


def _divisors_desc(n):
    return [d for d in range(n, 0, -1) if n % d == 0]


def _tpu_kind():
    try:
        return jax.devices()[0].device_kind.lower()
    except Exception:  # pragma: no cover - e.g. no devices during tracing
        return ""


def _vmem_budget_bytes(kind):
    """Per-generation VMEM budget for the pipelined working set."""
    if "v5" in kind or "v6" in kind:
        return 100 * 1024 * 1024      # 128 MiB physical; leave headroom
    return 44 * 1024 * 1024           # v7x has 64 MiB physical; conservative


def _pick_tiling(E, D_in, D_out, B, w_item, x_item, scratch_per_tn,
                 budget, prefer_split):
    """Largest (tn, Et) whose pipelined working set fits the VMEM budget.

    scratch_per_tn: f32 scratch bytes per output-tile column
                    (B*4 for the y-acc path, D_in*4 for the W-avg path).
    prefer_split:   keep >= 2 output tiles when possible so the 'parallel'
                    grid axis can shard across TensorCores (v7x megacore).
    """
    tn_cands = [d for d in _divisors_desc(D_out) if d % 128 == 0] or [D_out]
    if prefer_split:
        split = [t for t in tn_cands if D_out // t >= 2]
        if split:
            tn_cands = split

    def need(tn, et):
        return (2 * et * D_in * tn * w_item     # double-buffered weight tiles
                + tn * scratch_per_tn           # f32 accumulator scratch
                + 2 * B * D_in * x_item         # x (resident, 2 buffers)
                + 2 * B * tn * x_item           # output tile (2 buffers)
                + 2 * E * tn * w_item)          # bias (resident per out tile)

    for tn in tn_cands:                          # biggest tn first
        for et in _divisors_desc(E):             # biggest ensemble block first
            if need(tn, et) <= budget:
                return tn, et
    # Nothing fits the budget cleanly: smallest config, let Mosaic try.
    return tn_cands[-1], 1


# ----------------------------------------------------------------- wrapper --


def ensemble_forward(x, w_stack, b_stack, *, mode="auto"):
    """Average of E linear models, fused into one Pallas kernel.

    x:       (B, D_in)
    w_stack: (E, D_in, D_out)
    b_stack: (E, D_out)
    mode:    "auto" | "y" (partial-output accumulation) | "w" (weight avg)
    returns: (B, D_out) in x.dtype
    """
    B, D_in = x.shape
    E, d_in2, D_out = w_stack.shape
    assert d_in2 == D_in and b_stack.shape == (E, D_out)

    if mode == "auto":
        # Weight averaging only pays off once the batch is large enough that
        # E per-member matmuls would no longer hide under the weight DMA.
        mode = "w" if B > 256 else "y"

    inv_e = 1.0 / float(E)            # static Python float
    w_item = jnp.dtype(w_stack.dtype).itemsize
    x_item = jnp.dtype(x.dtype).itemsize

    kind = _tpu_kind()
    budget = _vmem_budget_bytes(kind)
    single_core = ("v5" in kind) or ("v6" in kind)
    prefer_split = not single_core    # v7x (and unknown): 2 TensorCores/chip

    if mode == "y":
        scratch_per_tn = B * 4
        kernel = functools.partial(_ensemble_yacc_kernel, inv_e=inv_e)
    else:
        scratch_per_tn = D_in * 4
        kernel = functools.partial(_ensemble_wavg_kernel, inv_e=inv_e)

    tn, et = _pick_tiling(E, D_in, D_out, B, w_item, x_item, scratch_per_tn,
                          budget, prefer_split)

    if mode == "y":
        scratch = pltpu.VMEM((B, tn), jnp.float32)
    else:
        scratch = pltpu.VMEM((D_in, tn), jnp.float32)

    grid = (D_out // tn, E // et)

    grid_spec = pltpu.PrefetchScalarGridSpec(
        num_scalar_prefetch=0,
        grid=grid,                                    # reduction axis last
        in_specs=[
            # x: resident, same block at every grid step
            pl.BlockSpec((B, D_in), lambda j, e: (0, 0)),
            # fat per-step weight block: Et members x (D_in, tn)
            pl.BlockSpec((et, D_in, tn), lambda j, e: (e, 0, j)),
            # full-ensemble bias tile, resident across the ensemble axis
            pl.BlockSpec((E, tn), lambda j, e: (0, j)),
        ],
        # same output block across the ensemble axis -> resident / revisited
        out_specs=pl.BlockSpec((B, tn), lambda j, e: (0, j)),
        scratch_shapes=[scratch],
    )

    return pl.pallas_call(
        kernel,
        out_shape=jax.ShapeDtypeStruct((B, D_out), x.dtype),
        grid_spec=grid_spec,
        compiler_params=pltpu.CompilerParams(
            dimension_semantics=("parallel", "arbitrary"),
            vmem_limit_bytes=int(budget),
        ),
    )(x, w_stack, b_stack)


# -------------------------------------------------------------------- demo --


if __name__ == "__main__":
    # Ensemble of E=4 Linear(128 -> 256) members, batch of 8.  D_in/D_out are
    # multiples of 128 so all blocks are lane-dense.
    B, D_in, D_out, E = 8, 128, 256, 4

    key = jax.random.PRNGKey(0)
    kx, kw, kb = jax.random.split(key, 3)

    x = jax.random.normal(kx, (B, D_in), dtype=jnp.float32)
    w_stack = jax.random.normal(kw, (E, D_in, D_out), dtype=jnp.float32) * 0.1
    b_stack = jax.random.normal(kb, (E, D_out), dtype=jnp.float32) * 0.1

    # Pure-JAX reference: average of the E linear models' outputs.
    ref = jnp.mean(
        jnp.einsum("bi,eio->ebo", x, w_stack) + b_stack[:, None, :], axis=0
    )

    # 1) default path (partial-output accumulation), f32
    out = jax.block_until_ready(ensemble_forward(x, w_stack, b_stack))
    assert out.shape == (B, D_out)
    assert jnp.allclose(out, ref, atol=1e-4, rtol=1e-4), "f32 (y) mismatch"

    # 2) weight-averaging path (the large-batch variant), f32
    out_w = jax.block_until_ready(ensemble_forward(x, w_stack, b_stack, mode="w"))
    assert jnp.allclose(out_w, ref, atol=1e-4, rtol=1e-4), "f32 (w) mismatch"

    # 3) bf16 inputs (halves weight HBM traffic; f32 accumulation in-kernel)
    out_bf16 = jax.block_until_ready(
        ensemble_forward(
            x.astype(jnp.bfloat16),
            w_stack.astype(jnp.bfloat16),
            b_stack.astype(jnp.bfloat16),
        )
    )
    assert out_bf16.dtype == jnp.bfloat16
    assert jnp.allclose(
        out_bf16.astype(jnp.float32), ref, atol=3e-2, rtol=3e-2
    ), "bf16 mismatch"

    print("KERNEL_OK")
</pallas_src>

<mosaic_0001>
module attributes {stable_mosaic.version = 11 : i64} {
  func.func @_ensemble_yacc_kernel(%arg0: i32, %arg1: i32, %arg2: memref<8x128xf32, #tpu.memory_space<vmem>>, %arg3: memref<4x128x128xf32, #tpu.memory_space<vmem>>, %arg4: memref<4x128xf32, #tpu.memory_space<vmem>>, %arg5: memref<8x128xf32, #tpu.memory_space<vmem>>, %arg6: memref<8x128xf32, #tpu.memory_space<vmem>>) attributes {dimension_semantics = [#tpu.dimension_semantics<parallel>, #tpu.dimension_semantics<arbitrary>], iteration_bounds = array<i64: 2, 1>, scalar_prefetch = 0 : i64, scratch_operands = 1 : i64, tpu.core_type = #tpu.core_type<tc>, window_params = [{pipeline_mode = #tpu.pipeline_mode<synchronous>, transform_indices = @transform_0, window_bounds = array<i64: 8, 128>}, {transform_indices = @transform_1, window_bounds = array<i64: 4, 128, 128>}, {transform_indices = @transform_2, window_bounds = array<i64: 4, 128>}, {transform_indices = @transform_3, window_bounds = array<i64: 8, 128>}]} {
    %c0 = arith.constant 0 : index
    %c0_0 = arith.constant 0 : index
    %0 = vector.load %arg2[%c0, %c0_0] : memref<8x128xf32, #tpu.memory_space<vmem>>, vector<8x128xf32>
    %c0_1 = arith.constant 0 : index
    %c0_2 = arith.constant 0 : index
    %c0_3 = arith.constant 0 : index
    %1 = vector.load %arg3[%c0_1, %c0_2, %c0_3] : memref<4x128x128xf32, #tpu.memory_space<vmem>>, vector<1x128x128xf32>
    %2 = vector.shape_cast %1 : vector<1x128x128xf32> to vector<128x128xf32>
    %cst = arith.constant dense<0.000000e+00> : vector<8x128xf32>
    %3 = tpu.matmul %0, %2, %cst {dimension_numbers = #tpu.dot_dimension_numbers<[1], [0], [0], [1], [0, 0, 1, 1], [], []>} : vector<8x128xf32>, vector<128x128xf32>, vector<8x128xf32> -> vector<8x128xf32>
    %c1 = arith.constant 1 : index
    %c0_4 = arith.constant 0 : index
    %c0_5 = arith.constant 0 : index
    %4 = vector.load %arg3[%c1, %c0_4, %c0_5] : memref<4x128x128xf32, #tpu.memory_space<vmem>>, vector<1x128x128xf32>
    %5 = vector.shape_cast %4 : vector<1x128x128xf32> to vector<128x128xf32>
    %cst_6 = arith.constant dense<0.000000e+00> : vector<8x128xf32>
    %6 = tpu.matmul %0, %5, %cst_6 {dimension_numbers = #tpu.dot_dimension_numbers<[1], [0], [0], [1], [0, 0, 1, 1], [], []>} : vector<8x128xf32>, vector<128x128xf32>, vector<8x128xf32> -> vector<8x128xf32>
    %7 = arith.addf %3, %6 : vector<8x128xf32>
    %c2 = arith.constant 2 : index
    %c0_7 = arith.constant 0 : index
    %c0_8 = arith.constant 0 : index
    %8 = vector.load %arg3[%c2, %c0_7, %c0_8] : memref<4x128x128xf32, #tpu.memory_space<vmem>>, vector<1x128x128xf32>
    %9 = vector.shape_cast %8 : vector<1x128x128xf32> to vector<128x128xf32>
    %cst_9 = arith.constant dense<0.000000e+00> : vector<8x128xf32>
    %10 = tpu.matmul %0, %9, %cst_9 {dimension_numbers = #tpu.dot_dimension_numbers<[1], [0], [0], [1], [0, 0, 1, 1], [], []>} : vector<8x128xf32>, vector<128x128xf32>, vector<8x128xf32> -> vector<8x128xf32>
    %11 = arith.addf %7, %10 : vector<8x128xf32>
    %c3 = arith.constant 3 : index
    %c0_10 = arith.constant 0 : index
    %c0_11 = arith.constant 0 : index
    %12 = vector.load %arg3[%c3, %c0_10, %c0_11] : memref<4x128x128xf32, #tpu.memory_space<vmem>>, vector<1x128x128xf32>
    %13 = vector.shape_cast %12 : vector<1x128x128xf32> to vector<128x128xf32>
    %cst_12 = arith.constant dense<0.000000e+00> : vector<8x128xf32>
    %14 = tpu.matmul %0, %13, %cst_12 {dimension_numbers = #tpu.dot_dimension_numbers<[1], [0], [0], [1], [0, 0, 1, 1], [], []>} : vector<8x128xf32>, vector<128x128xf32>, vector<8x128xf32> -> vector<8x128xf32>
    %15 = arith.addf %11, %14 : vector<8x128xf32>
    %c0_i32 = arith.constant 0 : i32
    %16 = arith.cmpi eq, %arg1, %c0_i32 : i32
    %17 = arith.extui %16 : i1 to i32
    %c0_i32_13 = arith.constant 0 : i32
    %18 = arith.cmpi ne, %17, %c0_i32_13 : i32
    scf.if %18 {
      %c0_18 = arith.constant 0 : index
      %c0_19 = arith.constant 0 : index
      %25 = vector.load %arg6[%c0_18, %c0_19] : memref<8x128xf32, #tpu.memory_space<vmem>>, vector<8x128xf32>
      tpu.vector_store %arg6[%c0_18, %c0_19], %15 {strides = array<i32>} : memref<8x128xf32, #tpu.memory_space<vmem>>, vector<8x128xf32>,
    } else {
    }
    %c0_i32_14 = arith.constant 0 : i32
    %19 = arith.cmpi sgt, %arg1, %c0_i32_14 : i32
    %20 = arith.extui %19 : i1 to i32
    %c0_i32_15 = arith.constant 0 : i32
    %21 = arith.cmpi ne, %20, %c0_i32_15 : i32
    scf.if %21 {
      %c0_18 = arith.constant 0 : index
      %c0_19 = arith.constant 0 : index
      %25 = vector.load %arg6[%c0_18, %c0_19] : memref<8x128xf32, #tpu.memory_space<vmem>>, vector<8x128xf32>
      %26 = arith.addf %25, %15 : vector<8x128xf32>
      %c0_20 = arith.constant 0 : index
      %c0_21 = arith.constant 0 : index
      %27 = vector.load %arg6[%c0_20, %c0_21] : memref<8x128xf32, #tpu.memory_space<vmem>>, vector<8x128xf32>
      tpu.vector_store %arg6[%c0_20, %c0_21], %26 {strides = array<i32>} : memref<8x128xf32, #tpu.memory_space<vmem>>, vector<8x128xf32>,
    } else {
    }
    %c0_i32_16 = arith.constant 0 : i32
    %22 = arith.cmpi eq, %arg1, %c0_i32_16 : i32
    %23 = arith.extui %22 : i1 to i32
    %c0_i32_17 = arith.constant 0 : i32
    %24 = arith.cmpi ne, %23, %c0_i32_17 : i32
    scf.if %24 {
      %c0_18 = arith.constant 0 : index
      %c0_19 = arith.constant 0 : index
      %25 = vector.load %arg4[%c0_18, %c0_19] : memref<4x128xf32, #tpu.memory_space<vmem>>, vector<4x128xf32>
      %cst_20 = arith.constant dense<0.000000e+00> : vector<128xf32>
      %26 = vector.multi_reduction <add>, %25, %cst_20 [0] : vector<4x128xf32> to vector<128xf32>
      %27 = vector.shape_cast %26 : vector<128xf32> to vector<1x128xf32>
      %c0_21 = arith.constant 0 : index
      %c0_22 = arith.constant 0 : index
      %28 = vector.load %arg6[%c0_21, %c0_22] : memref<8x128xf32, #tpu.memory_space<vmem>>, vector<8x128xf32>
      %29 = vector.broadcast %27 : vector<1x128xf32> to vector<8x128xf32>
      %30 = arith.addf %28, %29 : vector<8x128xf32>
      %cst_23 = arith.constant 2.500000e-01 : f32
      %31 = vector.broadcast %cst_23 : f32 to vector<8x128xf32>
      %32 = arith.mulf %30, %31 : vector<8x128xf32>
      %c0_24 = arith.constant 0 : index
      %c0_25 = arith.constant 0 : index
      %33 = vector.load %arg5[%c0_24, %c0_25] : memref<8x128xf32, #tpu.memory_space<vmem>>, vector<8x128xf32>
      tpu.vector_store %arg5[%c0_24, %c0_25], %32 {strides = array<i32>} : memref<8x128xf32, #tpu.memory_space<vmem>>, vector<8x128xf32>,
    } else {
    }
    return
  }
  func.func @transform_0(%arg0: i32, %arg1: i32) -> (i32, i32) {
    %c0_i32 = arith.constant 0 : i32
    %c0_i32_0 = arith.constant 0 : i32
    %c0_i32_1 = arith.constant 0 : i32
    return %c0_i32, %c0_i32_0 : i32, i32
  }
  func.func @transform_1(%arg0: i32, %arg1: i32) -> (i32, i32, i32) {
    %c0_i32 = arith.constant 0 : i32
    %c0_i32_0 = arith.constant 0 : i32
    return %arg1, %c0_i32, %arg0 : i32, i32, i32
  }
  func.func @transform_2(%arg0: i32, %arg1: i32) -> (i32, i32) {
    %c0_i32 = arith.constant 0 : i32
    %c0_i32_0 = arith.constant 0 : i32
    return %c0_i32, %arg0 : i32, i32
  }
  func.func @transform_3(%arg0: i32, %arg1: i32) -> (i32, i32) {
    %c0_i32 = arith.constant 0 : i32
    %c0_i32_0 = arith.constant 0 : i32
    return %c0_i32, %arg0 : i32, i32
  }
}

</mosaic_0001>

<bundles_post_ra>
// kernel: tpu_custom_call.1
= control target key start
LH: loop header
LB: loop body
LE: loop exit
PB: predicated region body
PF: predicated region fallthrough
CT: control target
= control target key end

     0   :  { %s1780_s0 = inlined_call_operand.hbm [shape: f32[8,128], index: 0, kind: input, shape index: {}]   ;;  %s1781_s1 = inlined_call_operand.hbm [shape: f32[4,128,256], index: 1, kind: input, shape index: {}]   ;;  %s1782_s2 = inlined_call_operand.hbm [shape: f32[4,256], index: 2, kind: input, shape index: {}]   ;;  %s1783_s3 = inlined_call_operand.hbm [shape: f32[8,256], index: 3, kind: output, shape index: {}]  }
   0x1   :  { %1789 = sst [smem:[#allocation13_spill]] %s1781_s1 }
   0x2   :  { %8 = vsyncpa [#allocation4], 0 }
   0x3   :  { %9 = vsyncpa [#allocation7], 0 }
   0x4   :  { %11 = vsyncpa [#allocation7 + $0x1], 0 }
   0x5   :  { %12 = vsyncpa [#allocation5], 0 }
   0x6   :  { %14 = vsyncpa [#allocation5 + $0x1], 0  ;;  %s1417_s12 = smov 0   ;;  %s1419_s13 = smov 0  }
   0x7   :  { %s1421_s14 = smov 0   ;;  %s1423_s15 = smov 0  }
   0x8   :  { %s1425_s16 = smov 0   ;;  %s1427_s17 = smov 0  }
   0x9 LB: > { %s32_s18 = sadd.s32 1, %s1381_s16  ;;  %s62_s19 = sadd.s32 1, %s1373_s14  ;;  %s1385_s17 = sphi %s1427_s17, %s20_s17   ;;  %s1381_s16 = sphi %s1425_s16, %s1809_s16   ;;  %s1377_s15 = sphi %s1423_s15, %s1808_s15   ;;  %s1373_s14 = sphi %s1421_s14, %s1807_s14   ;;  %s1369_s13 = sphi %s1419_s13, %s1806_s13   ;;  %s1365_s12 = sphi %s1417_s12, %s1805_s12  }
   0xa   : > { %p34_p0 = scmp.ge.s32.totalorder %s32_s18, 2  ;;  %p69_p1 = scmp.ne.s32.totalorder %s1373_s14, %s1369_s13 }
   0xb   : > { %p70_p2 = scmp.eq.s32.totalorder %s1385_s17, 0  ;;  %p1153_p5 = scmp.lt.s32.totalorder %s1385_s17, 2 }
   0xc   : > { %s1811_s18 = smov (%p34_p0, %s32_s18), 0  ;;  %s162_s21 = sand.u32 1, %s1385_s17  }
   0xd   : > { %p71_p4 = por %p70_p2, %p69_p1  ;;  %s58_s20 = ssub.s32 %s1381_s16, %s1811_s18 }
   0xe   : > { %p60_p6 = scmp.eq.s32.totalorder %s58_s20, 0  ;;  %s164_s22 = sand.u32 1, %s1373_s14  }
   0xf   : > { %s763_s23 = sshll.u32 %s1381_s16, 7  ;;  %s762_s25 = sshll.u32 %s164_s22, 9 }
  0x10   : > { %s1465_s24 = scalar_select %p60_p6, %s1373_s14, %s62_s19  }
  0x11   : > { %s1790_s1 = sld [smem:[#allocation13_spill]]  ;;  %p1474_p7 = pnand %p1153_p5, %p71_p4 }
  0x12   : > { %s166_s30 = scalar_lea.vmem [#allocation6], %s762_s25  ;;  %s1480_s5 = scalar_lea.sflag [#allocation7], %s162_s21 }
  0x13   : > { %s175_s4 = sshll.u32 %s166_s30, 4  ;;  %p1213_p9 = pneg %p1474_p7  ;;  %s1478_s4 = int_to_ptr.vmem [resolvable:$true] %s175_s4 }
  0x17   : > { %s1472_s28 = scalar_lea.hbm %s1790_s1, %s763_s23  ;;  %s1216_s9 = scalar_lea.hbm %s1790_s1, 16384 }
  0x18   : > { %s1211_s6 = scalar_lea.hbm %s1472_s28, 8192  ;;  %p1217_p12 = scmp.lt.u32.totalorder %s1472_s28, %s1790_s1 }
  0x19   : > { %p1212_p8 = scmp.ne.s32.totalorder %s1472_s28, %s1211_s6  ;;  %p1218_p13 = scmp.lt.u32.totalorder %s1216_s9, %s1211_s6 }
  0x1a   : > { %p1220_p2 = scmp.lt.u32.totalorder %s1211_s6, %s1472_s28 }
  0x1b   : > { %p1214_p10 = pnand %p1213_p9, %p1212_p8  ;;  %p1219_p0 = por %p1218_p13, %p1217_p12 }
  0x1d   : > { %p1215_p11 = pneg %p1214_p10  ;;  %p1221_p4 = por %p1220_p2, %p1219_p0 }
  0x1f   : > { %p1222_p5 = pnand %p1221_p4, %p1215_p11 }
  0x21   : > { %1225 = shalt.err (!%p1222_p5)
}
  0x22   : > { %s1226_s19 = scalar_lea.vmem %s1478_s4, 8192  ;;  %s1387_s20 = smov [#allocation6]  }
  0x23   : > { %p1227_p6 = scmp.ne.s32.totalorder %s1478_s4, %s1226_s19  ;;  %s1231_s21 = sshll.u32 %s1387_s20, 4  ;;  %s1232_s21 = int_to_ptr.vmem [resolvable:$false] %s1231_s21 }
  0x24   : > { %s1233_s23 = scalar_lea.vmem %s1232_s21, 16384  ;;  %p1234_p3 = scmp.lt.s32.totalorder %s1478_s4, %s1232_s21 }
  0x25   : > { %p1229_p8 = pnand %p1227_p6, %p1213_p9  ;;  %p1235_p12 = scmp.lt.s32.totalorder %s1233_s23, %s1226_s19 }
  0x27   : > { %p1230_p10 = pneg %p1229_p8  ;;  %p1236_p13 = por %p1235_p12, %p1234_p3 }
  0x29   : > { %p1237_p0 = pnand %p1236_p13, %p1230_p10 }
  0x2b   : > { %1240 = shalt.err (!%p1237_p0)
}
  0x2c   : > { %s1388_s25 = smov 256   ;;  %s1389_s26 = smov 128  }
  0x2d   : > { %s1390_s27 = smov 8   ;;  %s1509_s30 = sadd.s32 4294967295, %s1385_s17  }
  0x2e   : > { %1144 = dma.hbm_to_vmem [thread:$0]  (!%p1474_p7), %s1472_s28, 8192, %s1478_s4, %s1480_s5, %s1388_s25, %s1389_s26, %s1390_s27  }
  0x2f   : > { %s758_s6 = sadd.s32 4294967294, %s1385_s17   ;;  %p75_p3 = scmp.ne.s32.totalorder %s1369_s13, %s1365_s12 }
  0x30   : > { %p1784_p11 = scmp.eq.s32.totalorder %s1509_s30, 0  ;;  %p125_p2 = scmp.eq.s32.totalorder %s1509_s30, 1 }
  0x31   : > { %p131_p4 = scmp.eq.s32.totalorder %s758_s6, 1  ;;  %p759_p6 = scmp.ge.s32.totalorder %s1385_s17, 1 }
  0x32   : > { %p1518_p5 = por %p1784_p11, %p75_p3  ;;  %p1526_p8 = por %p125_p2, %p69_p1 }
  0x33   : > { %p1530_p10 = por %p131_p4, %p75_p3  ;;  %p138_p12 = scmp.lt.s32.totalorder %s1385_s17, 3 }
  0x34   : > { %s1792_s7 = scalar_select %p1518_p5, 1, 0 }
  0x35   : > { %s1793_s28 = scalar_select %p1526_p8, 1, 0 }
  0x36   : > { %s1794_s4 = scalar_select %p1530_p10, 1, 0 }
  0x37   : > { %s764_s8 = sshll.u32 %s164_s22, 2  ;;  %p1537_p13 = pnand %p759_p6, %p138_p12 }
  0x38   : > { %s1391_s10 = smov [#allocation3]   ;;  %s765_s19 = sshll.u32 %s1381_s16, 6 }
  0x39   : > { %s1795_s9 = scalar_select %p1537_p13, 1, 0 }
  0x3a   : > { %s151_s11 = sshll.u32 %s1391_s10, 4  ;;  %p1137_p1 = pneg %p1537_p13  ;;  %s1541_s11 = int_to_ptr.vmem [resolvable:$true] %s151_s11 }
  0x3b   : > { %s1549_s23 = scalar_lea.hbm %s1782_s2, %s765_s19  ;;  %s189_s22 = scalar_lea.vmem [#allocation8], %s764_s8 }
  0x3c   : > { %s196_s25 = sshll.u32 %s189_s22, 4  ;;  %p1553_p0 = pnand %p1137_p1, %p1784_p11  ;;  %s197_s25 = int_to_ptr.vmem [resolvable:$true] %s196_s25 }
  0x3d   : > { %s1241_s27 = scalar_lea.hbm %s1549_s23, 64  ;;  %s1246_s19 = scalar_lea.hbm %s1782_s2, 128 }
  0x3e   : > { %s1796_s26 = scalar_select %p1553_p0, 1, 0 }
  0x3f   : > { %p1242_p3 = scmp.ne.s32.totalorder %s1549_s23, %s1241_s27  ;;  %p1247_p6 = scmp.lt.u32.totalorder %s1549_s23, %s1782_s2 }
  0x40   : > { %p1248_p12 = scmp.lt.u32.totalorder %s1246_s19, %s1241_s27  ;;  %p1250_p11 = scmp.lt.u32.totalorder %s1241_s27, %s1549_s23 }
  0x41   : > { %p1244_p2 = pnand %p1242_p3, %p1213_p9 }
  0x42   : > { %p1249_p1 = por %p1248_p12, %p1247_p6 }
  0x43   : > { %p1245_p4 = pneg %p1244_p2 }
  0x44   : > { %p1251_p10 = por %p1250_p11, %p1249_p1 }
  0x46   : > { %p1252_p8 = pnand %p1251_p10, %p1245_p4 }
  0x48   : > { %1255 = shalt.err (!%p1252_p8)
}
  0x49   : > { %s1256_s8 = scalar_lea.vmem %s197_s25, 64  ;;  %s1392_s22 = smov [#allocation8]  }
  0x4a   : > { %p1257_p5 = scmp.ne.s32.totalorder %s197_s25, %s1256_s8  ;;  %s1261_s6 = sshll.u32 %s1392_s22, 4  ;;  %s1262_s6 = int_to_ptr.vmem [resolvable:$false] %s1261_s6 }
  0x4b   : > { %s1263_s10 = scalar_lea.vmem %s1262_s6, 128  ;;  %p1264_p13 = scmp.lt.s32.totalorder %s197_s25, %s1262_s6 }
  0x4c   : > { %p1259_p3 = pnand %p1257_p5, %p1213_p9  ;;  %p1265_p0 = scmp.lt.s32.totalorder %s1263_s10, %s1256_s8 }
  0x4e   : > { %p1260_p2 = pneg %p1259_p3  ;;  %p1266_p6 = por %p1265_p0, %p1264_p13 }
  0x50   : > { %p1267_p12 = pnand %p1266_p6, %p1260_p2 }
  0x52   : > { %1270 = shalt.err (!%p1267_p12)
}
  0x53   : > { %1147 = dma.hbm_to_vmem [thread:$0]  (!%p1474_p7), %s1549_s23, 64, %s197_s25, %s1480_s5  }
  0x54   : > { %s1271_s20 = scalar_lea.hbm %s1780_s0, 128  ;;  %p1797_p11 = scmp.ne.s32.totalorder %s1796_s26, 0 }
  0x55   : > { %p1272_p9 = scmp.ne.s32.totalorder %s1780_s0, %s1271_s20  ;;  %p1278_p13 = scmp.lt.u32.totalorder %s1271_s20, %s1780_s0 }
  0x56   : > { %p1273_p5 = pneg %p1797_p11 }
  0x58   : > { %p1274_p8 = pnand %p1273_p5, %p1272_p9 }
  0x5a   : > { %p1275_p10 = pneg %p1274_p8 }
  0x5c   : > { %p1280_p0 = pnand %p1278_p13, %p1275_p10 }
  0x5e   : > { %1283 = shalt.err (!%p1280_p0)
}
  0x5f   : > { %s1284_s29 = scalar_lea.vmem %s1541_s11, 128  ;;  %p1292_p3 = scmp.lt.s32.totalorder %s1541_s11, %s1541_s11 }
  0x60   : > { %p1285_p7 = scmp.ne.s32.totalorder %s1541_s11, %s1284_s29  ;;  %p1293_p2 = scmp.lt.s32.totalorder %s1284_s29, %s1284_s29 }
  0x62   : > { %p1287_p4 = pnand %p1285_p7, %p1273_p5  ;;  %p1294_p6 = por %p1293_p2, %p1292_p3 }
  0x64   : > { %p1288_p1 = pneg %p1287_p4 }
  0x66   : > { %p1295_p12 = pnand %p1294_p6, %p1288_p1 }
  0x68   : > { %1298 = shalt.err (!%p1295_p12)
}
  0x69   : > { %1140 = dma.hbm_to_vmem [thread:$0]  (!%p1797_p11), %s1780_s0, 128, %s1541_s11, [#allocation4]  }
  0x6a   : > { %p1798_p9 = scmp.ne.s32.totalorder %s1795_s9, 0 }
  0x6b   : > { %p1799_p8 = scmp.eq.s32.totalorder (!%p1798_p9), %s1509_s30, 0 }
  0x6c   : > { %205 = sbr.rel (%p1798_p9) target bundleno = 421 (0x1a5), region = 32 }
  0x73   : > { %1352 = dma.done.wait (%p1799_p8), [#allocation4], 128   ;;  %p1800_p5 = pmov %p1799_p8 }
  0x74   : > { %s211_s23 = sand.u32 1, %s1509_s30   ;;  %s1606_s25 = sand.u32 1, %s1369_s13  }
  0x75   : > { %1354 = vsyncadd (%p1800_p5), [#allocation4], 4294967168  ;;  %s768_s26 = sshll.u32 %s1606_s25, 9  ;;  %s212_s6 = scalar_lea.sflag [#allocation7], %s211_s23 }
  0x76   : > { %s1609_s10 = scalar_lea.vmem [#allocation6], %s768_s26  ;;  %p1801_p11 = scmp.ne.s32.totalorder %s1792_s7, 0 }
  0x78   : > { %1356 = dma.done.wait (%p1801_p11), %s212_s6, 8256  }
  0x79   : > { %1358 = vsyncadd (%p1801_p11), %s212_s6, 4294959040  ;;  %v1393_v0 = vmov 0.0|0.0   ;;  %vm1394_vm0 = vmmov 0   ;;  %v1395_v1 = vmov 0.0   ;;  %v771_v2 = vld [vmem:[%s1609_s10 + $0x80] sm:$0xff]  ;;  %v772_v3 = vld [vmem:[%s1609_s10 + $0x88] sm:$0xff] }
  0x7a   : > { %1031 = vmatprep.subr.bf16.mxu0 %v1393_v0  ;;  %1055 = vmatprep.subr.bf16.mxu1 %v1393_v0  ;;  %v254_v4 = vld [vmem:[%s1609_s10] sm:$0xff]  ;;  %v1032_v5 = vpack.c.bf16 %v772_v3, %v771_v2  ;;  %v255_v6 = vld [vmem:[%s1609_s10 + $0x8] sm:$0xff]  ;;  %v773_v7 = vld [vmem:[%s1609_s10 + $0x90] sm:$0xff]  ;;  %s769_s30 = sshll.u32 %s1606_s25, 2  ;;  %vm619_vm1 = vcmask 1043456   ;;  %s770_s9 = sshll.u32 %s1606_s25, 3 }
  0x7b   : > { %923 = vmatprep.mubr.msk.f32.mxu0 %vm1394_vm0, %v1395_v1  ;;  %958 = vmatprep.mubr.msk.f32.mxu1 %vm1394_vm0, %v1395_v1  ;;  %v774_v8 = vld [vmem:[%s1609_s10 + $0x98] sm:$0xff]  ;;  %v1056_v9 = vpack.c.bf16 %v255_v6, %v254_v4  ;;  %v256_v10 = vld [vmem:[%s1609_s10 + $0x10] sm:$0xff]  ;;  %v775_v14 = vld [vmem:[%s1609_s10 + $0xa0] sm:$0xff]  ;;  %s224_s7 = scalar_lea.vmem [#allocation8], %s769_s30  ;;  %s820_s11 = sshll.u32 %s1377_s15, 7 }
  0x7c   : > { %v257_v11 = vld [vmem:[%s1609_s10 + $0x18] sm:$0xff]  ;;  %1033 = vmatpush3.bf16.msra.mxu0 %v1032_v5  ;;  %v1035_v12 = vpack.c.bf16 %v774_v8, %v773_v7  ;;  %v776_v15 = vld [vmem:[%s1609_s10 + $0xa8] sm:$0xff]  ;;  %v258_v16 = vld [vmem:[%s1609_s10 + $0x20] sm:$0xff]  ;;  %s251_s27 = scalar_lea.vmem [#allocation9], %s770_s9  ;;  %s1731_s8 = scalar_lea.hbm %s1783_s3, %s820_s11 }
  0x7d   : > { %1057 = vmatpush3.bf16.msra.mxu1 %v1056_v9  ;;  %1034 = vmatprep.subr.bf16.mxu0 %v1393_v0  ;;  %v1059_v13 = vpack.c.bf16 %v257_v11, %v256_v10  ;;  %v259_v17 = vld [vmem:[%s1609_s10 + $0x28] sm:$0xff]  ;;  %v1038_v18 = vpack.c.bf16 %v776_v15, %v775_v14  ;;  %v777_v20 = vld [vmem:[%s1609_s10 + $0xb0] sm:$0xff]  ;;  %v778_v21 = vld [vmem:[%s1609_s10 + $0xb8] sm:$0xff]  ;;  %s645_s19 = sshll.u32 %s251_s27, 4  ;;  %s632_s22 = scalar_lea.sflag [#allocation5], %s1606_s25  ;;  %s1733_s19 = int_to_ptr.vmem [resolvable:$true] %s645_s19 }
  0x7e   : > { %1058 = vmatprep.subr.bf16.mxu1 %v1393_v0  ;;  %v1062_v19 = vpack.c.bf16 %v259_v17, %v258_v16  ;;  %v260_v22 = vld [vmem:[%s1609_s10 + $0x30] sm:$0xff]  ;;  %v261_v23 = vld [vmem:[%s1609_s10 + $0x38] sm:$0xff]  ;;  %v1041_v24 = vpack.c.bf16 %v778_v21, %v777_v20  ;;  %v779_v26 = vld [vmem:[%s1609_s10 + $0xc0] sm:$0xff]  ;;  %s1299_s29 = scalar_lea.vmem %s1733_s19, 128  ;;  %p1802_p13 = scmp.ne.s32.totalorder %s1793_s28, 0 }
  0x7f   : > { %v1065_v25 = vpack.c.bf16 %v261_v23, %v260_v22  ;;  %v780_v27 = vld [vmem:[%s1609_s10 + $0xc8] sm:$0xff]  ;;  %v262_v28 = vld [vmem:[%s1609_s10 + $0x40] sm:$0xff]  ;;  %v781_v32 = vld [vmem:[%s1609_s10 + $0xd0] sm:$0xff]  ;;  %p1300_p10 = scmp.ne.s32.totalorder %s1733_s19, %s1299_s29  ;;  %s1396_s15 = smov [#allocation9]  }
  0x80   : > { %1036 = vmatpush3.bf16.msra.mxu0 %v1035_v12  ;;  %v263_v29 = vld [vmem:[%s1609_s10 + $0x48] sm:$0xff]  ;;  %v1044_v30 = vpack.c.bf16 %v780_v27, %v779_v26  ;;  %v782_v33 = vld [vmem:[%s1609_s10 + $0xd8] sm:$0xff]  ;;  %v264_v34 = vld [vmem:[%s1609_s10 + $0x50] sm:$0xff]  ;;  %s1303_s1 = sshll.u32 %s1396_s15, 4  ;;  %s1304_s1 = int_to_ptr.vmem [resolvable:$false] %s1303_s1 }
  0x81   : > { %1060 = vmatpush3.bf16.msra.mxu1 %v1059_v13  ;;  %1037 = vmatprep.subr.bf16.mxu0 %v1393_v0  ;;  %v1068_v31 = vpack.c.bf16 %v263_v29, %v262_v28  ;;  %v265_v35 = vld [vmem:[%s1609_s10 + $0x58] sm:$0xff]  ;;  %v1047_v36 = vpack.c.bf16 %v782_v33, %v781_v32  ;;  %v783_v38 = vld [vmem:[%s1609_s10 + $0xe0] sm:$0xff]  ;;  %v784_v39 = vld [vmem:[%s1609_s10 + $0xe8] sm:$0xff]  ;;  %p1301_p0 = pnand %p1300_p10, %p1802_p13  ;;  %s1305_s5 = scalar_lea.vmem %s1304_s1, 256 }
  0x82   : > { %1061 = vmatprep.subr.bf16.mxu1 %v1393_v0  ;;  %v1071_v37 = vpack.c.bf16 %v265_v35, %v264_v34  ;;  %v266_v40 = vld [vmem:[%s1609_s10 + $0x60] sm:$0xff]  ;;  %v267_v41 = vld [vmem:[%s1609_s10 + $0x68] sm:$0xff]  ;;  %v1050_v42 = vpack.c.bf16 %v784_v39, %v783_v38  ;;  %v785_v44 = vld [vmem:[%s1609_s10 + $0xf0] sm:$0xff]  ;;  %p1306_p4 = scmp.lt.s32.totalorder %s1733_s19, %s1304_s1  ;;  %p1307_p1 = scmp.lt.s32.totalorder %s1305_s5, %s1299_s29 }
  0x83   : > { %v1074_v43 = vpack.c.bf16 %v267_v41, %v266_v40  ;;  %v786_v45 = vld [vmem:[%s1609_s10 + $0xf8] sm:$0xff]  ;;  %v268_v46 = vld [vmem:[%s1609_s10 + $0x70] sm:$0xff]  ;;  %v787_v50 = vld [vmem:[%s1609_s10 + $0x100] sm:$0xff]  ;;  %p1302_p7 = pneg %p1301_p0 }
  0x84   : > { %1039 = vmatpush3.bf16.msra.mxu0 %v1038_v18  ;;  %v269_v47 = vld [vmem:[%s1609_s10 + $0x78] sm:$0xff]  ;;  %v1053_v48 = vpack.c.bf16 %v786_v45, %v785_v44  ;;  %v788_v51 = vld [vmem:[%s1609_s10 + $0x108] sm:$0xff]  ;;  %v803_v52 = vld [vmem:[%s1609_s10 + $0x180] sm:$0xff]  ;;  %p1308_p3 = por %p1307_p1, %p1306_p4 }
  0x85   : > { %1063 = vmatpush3.bf16.msra.mxu1 %v1062_v19  ;;  %1040 = vmatprep.subr.bf16.mxu0 %v1393_v0  ;;  %v1077_v49 = vpack.c.bf16 %v269_v47, %v268_v46  ;;  %v804_v53 = vld [vmem:[%s1609_s10 + $0x188] sm:$0xff]  ;;  %v1671_v54 = vld [vmem:[#allocation3] sm:$0xff]  ;;  %v1080_v55 = vpack.c.bf16 %v788_v51, %v787_v50  ;;  %v789_v57 = vld [vmem:[%s1609_s10 + $0x110] sm:$0xff] }
  0x86   : > { %1064 = vmatprep.subr.bf16.mxu1 %v1393_v0  ;;  %v1104_v56 = vpack.c.bf16 %v804_v53, %v803_v52  ;;  %v790_v58 = vld [vmem:[%s1609_s10 + $0x118] sm:$0xff]  ;;  %v805_v59 = vld [vmem:[%s1609_s10 + $0x190] sm:$0xff]  ;;  %v791_v63 = vld [vmem:[%s1609_s10 + $0x120] sm:$0xff]  ;;  %p1309_p2 = pnand %p1308_p3, %p1302_p7 }
  0x87   : > { %v806_v60 = vld [vmem:[%s1609_s10 + $0x198] sm:$0xff]  ;;  %v1083_v61 = vpack.c.bf16 %v790_v58, %v789_v57  ;;  %v792_v2 = vld [vmem:[%s1609_s10 + $0x128] sm:$0xff]  ;;  %v807_v3 = vld [vmem:[%s1609_s10 + $0x1a0] sm:$0xff] }
  0x88   : > { %1042 = vmatpush3.bf16.msra.mxu0 %v1041_v24  ;;  %v1107_v62 = vpack.c.bf16 %v806_v60, %v805_v59  ;;  %v808_v4 = vld [vmem:[%s1609_s10 + $0x1a8] sm:$0xff]  ;;  %v1086_v5 = vpack.c.bf16 %v792_v2, %v791_v63  ;;  %v793_v7 = vld [vmem:[%s1609_s10 + $0x130] sm:$0xff]  ;;  %v794_v8 = vld [vmem:[%s1609_s10 + $0x138] sm:$0xff] }
  0x89   : > { %1066 = vmatpush3.bf16.msra.mxu1 %v1065_v25  ;;  %1043 = vmatprep.subr.bf16.mxu0 %v1393_v0  ;;  %v1110_v6 = vpack.c.bf16 %v808_v4, %v807_v3  ;;  %v809_v9 = vld [vmem:[%s1609_s10 + $0x1b0] sm:$0xff]  ;;  %v810_v10 = vld [vmem:[%s1609_s10 + $0x1b8] sm:$0xff]  ;;  %v795_v12 = vld [vmem:[%s1609_s10 + $0x140] sm:$0xff] }
  0x8a   : > { %1067 = vmatprep.subr.bf16.mxu1 %v1393_v0  ;;  %v1113_v11 = vpack.c.bf16 %v810_v10, %v809_v9  ;;  %v796_v13 = vld [vmem:[%s1609_s10 + $0x148] sm:$0xff]  ;;  %v811_v14 = vld [vmem:[%s1609_s10 + $0x1c0] sm:$0xff]  ;;  %v797_v18 = vld [vmem:[%s1609_s10 + $0x150] sm:$0xff] }
  0x8b   : > { %v812_v15 = vld [vmem:[%s1609_s10 + $0x1c8] sm:$0xff]  ;;  %v1092_v16 = vpack.c.bf16 %v796_v13, %v795_v12  ;;  %v798_v19 = vld [vmem:[%s1609_s10 + $0x158] sm:$0xff]  ;;  %v813_v20 = vld [vmem:[%s1609_s10 + $0x1d0] sm:$0xff] }
  0x8c   : > { %1045 = vmatpush3.bf16.msra.mxu0 %v1044_v30  ;;  %v1116_v17 = vpack.c.bf16 %v812_v15, %v811_v14  ;;  %v814_v21 = vld [vmem:[%s1609_s10 + $0x1d8] sm:$0xff]  ;;  %v1095_v22 = vpack.c.bf16 %v798_v19, %v797_v18  ;;  %v799_v24 = vld [vmem:[%s1609_s10 + $0x160] sm:$0xff]  ;;  %v800_v25 = vld [vmem:[%s1609_s10 + $0x168] sm:$0xff] }
  0x8d   : > { %1069 = vmatpush3.bf16.msra.mxu1 %v1068_v31  ;;  %1046 = vmatprep.subr.bf16.mxu0 %v1393_v0  ;;  %v1119_v23 = vpack.c.bf16 %v814_v21, %v813_v20  ;;  %v815_v26 = vld [vmem:[%s1609_s10 + $0x1e0] sm:$0xff]  ;;  %v816_v27 = vld [vmem:[%s1609_s10 + $0x1e8] sm:$0xff]  ;;  %v1098_v28 = vpack.c.bf16 %v800_v25, %v799_v24  ;;  %v801_v30 = vld [vmem:[%s1609_s10 + $0x170] sm:$0xff] }
  0x8e   : > { %1070 = vmatprep.subr.bf16.mxu1 %v1393_v0  ;;  %v1122_v29 = vpack.c.bf16 %v816_v27, %v815_v26  ;;  %v802_v31 = vld [vmem:[%s1609_s10 + $0x178] sm:$0xff]  ;;  %v817_v32 = vld [vmem:[%s1609_s10 + $0x1f0] sm:$0xff]  ;;  %v618_v41 = vld [vmem:[%s224_s7] sm:$0xf] }
  0x8f   : > { %v818_v33 = vld [vmem:[%s1609_s10 + $0x1f8] sm:$0xff]  ;;  %v1101_v34 = vpack.c.bf16 %v802_v31, %v801_v30 }
  0x90   : > { %1048 = vmatpush3.bf16.msra.mxu0 %v1047_v36  ;;  %v1125_v35 = vpack.c.bf16 %v818_v33, %v817_v32 }
  0x91   : > { %1072 = vmatpush3.bf16.msra.mxu1 %v1071_v37  ;;  %1049 = vmatprep.subr.bf16.mxu0 %v1393_v0 }
  0x92   : > { %1073 = vmatprep.subr.bf16.mxu1 %v1393_v0 }
  0x94   : > { %1051 = vmatpush3.bf16.msra.mxu0 %v1050_v42  ;;  %v620_v42 = vsel %vm619_vm1, %v618_v41, 0.0 }
  0x95   : > { %1075 = vmatpush3.bf16.msra.mxu1 %v1074_v43  ;;  %1052 = vmatprep.subr.bf16.mxu0 %v1393_v0  ;;  %v621_v43 = vrot.slane %v620_v42, 4 }
  0x96   : > { %1076 = vmatprep.subr.bf16.mxu1 %v1393_v0 }
  0x98   : > { %1054 = vmatpush3.bf16.msra.mxu0 %v1053_v48 }
  0x99   : > { %1078 = vmatpush3.bf16.msra.mxu1 %v1077_v49  ;;  %1079 = vmatprep.subr.bf16.mxu0 %v1393_v0 }
  0x9a   : > { %1103 = vmatprep.subr.bf16.mxu1 %v1393_v0 }
  0x9b   : > { %924 = vmatmul.mubr.f32.vlgmr.msra.gmra.mrb[0].mxu0 %v1671_v54 }
  0x9c   : > { %959 = vmatmul.mubr.f32.vlgmr.msra.gmra.mrb[0].mxu1 %v1671_v54  ;;  %1081 = vmatpush3.bf16.msra.mxu0 %v1080_v55 }
  0x9d   : > { %1105 = vmatpush3.bf16.msra.mxu1 %v1104_v56  ;;  %1082 = vmatprep.subr.bf16.mxu0 %v1393_v0 }
  0x9e   : > { %1106 = vmatprep.subr.bf16.mxu1 %v1393_v0  ;;  %993 = vmatprep.mubr.msk.f32.mxu0 %vm1394_vm0, %v1395_v1 }
  0x9f   : > { %1028 = vmatprep.mubr.msk.f32.mxu1 %vm1394_vm0, %v1395_v1  ;;  %v1089_v1 = vpack.c.bf16 %v794_v8, %v793_v7 }
  0xa0   : > { %1084 = vmatpush3.bf16.msra.mxu0 %v1083_v61 }
  0xa1   : > { %1108 = vmatpush3.bf16.msra.mxu1 %v1107_v62  ;;  %1085 = vmatprep.subr.bf16.mxu0 %v1393_v0 }
  0xa2   : > { %1109 = vmatprep.subr.bf16.mxu1 %v1393_v0 }
  0xa4   : > { %1087 = vmatpush3.bf16.msra.mxu0 %v1086_v5 }
  0xa5   : > { %1111 = vmatpush3.bf16.msra.mxu1 %v1110_v6  ;;  %1088 = vmatprep.subr.bf16.mxu0 %v1393_v0 }
  0xa6   : > { %1112 = vmatprep.subr.bf16.mxu1 %v1393_v0 }
  0xa8   : > { %1090 = vmatpush3.bf16.msra.mxu0 %v1089_v1 }
  0xa9   : > { %1114 = vmatpush3.bf16.msra.mxu1 %v1113_v11  ;;  %1091 = vmatprep.subr.bf16.mxu0 %v1393_v0 }
  0xaa   : > { %1115 = vmatprep.subr.bf16.mxu1 %v1393_v0 }
  0xac   : > { %1093 = vmatpush3.bf16.msra.mxu0 %v1092_v16 }
  0xad   : > { %1117 = vmatpush3.bf16.msra.mxu1 %v1116_v17  ;;  %1094 = vmatprep.subr.bf16.mxu0 %v1393_v0 }
  0xae   : > { %1118 = vmatprep.subr.bf16.mxu1 %v1393_v0 }
  0xb0   : > { %1096 = vmatpush3.bf16.msra.mxu0 %v1095_v22 }
  0xb1   : > { %1120 = vmatpush3.bf16.msra.mxu1 %v1119_v23  ;;  %1097 = vmatprep.subr.bf16.mxu0 %v1393_v0 }
  0xb2   : > { %1121 = vmatprep.subr.bf16.mxu1 %v1393_v0 }
  0xb4   : > { %1099 = vmatpush3.bf16.msra.mxu0 %v1098_v28 }
  0xb5   : > { %1123 = vmatpush3.bf16.msra.mxu1 %v1122_v29  ;;  %1100 = vmatprep.subr.bf16.mxu0 %v1393_v0 }
  0xb6   : > { %1124 = vmatprep.subr.bf16.mxu1 %v1393_v0  ;;  %v622_v0 = vadd.f32 %v621_v43, %v620_v42 }
  0xb8   : > { %1102 = vmatpush3.bf16.msra.mxu0 %v1101_v34  ;;  %v623_v44 = vrot.slane %v622_v0, 2 }
  0xb9   : > { %1126 = vmatpush3.bf16.msra.mxu1 %v1125_v35 }
  0xba   : > { %v624_v45 = vadd.f32 %v623_v44, %v622_v0 }
  0xbb   : > { %994 = vmatmul.mubr.f32.vlgmr.msra.gmra.mrb[2].mxu0 %v1671_v54 }
  0xbc   : > { %1029 = vmatmul.mubr.f32.vlgmr.msra.gmra.mrb[2].mxu1 %v1671_v54  ;;  %v625_v46 = vrot.slane %v624_v45, 1 }
  0xbe   : > { %v626_v51 = vadd.f32 %v625_v46, %v624_v45 }
 0x16e   : > { %v353_v36 = vpop.f32.mrb[0].mxu0 }
 0x16f   : > { %v925_v37 = vpop.f32.mrb[1].mxu0  ;;  %v423_v38 = vpop.f32.mrb[0].mxu1 }
 0x170   : > { %v424_v39 = vadd.f32 %v423_v38, %v353_v36  ;;  %v960_v40 = vpop.f32.mrb[1].mxu1 }
 0x18e   : > { %v510_v47 = vpop.f32.mrb[2].mxu0 }
 0x18f   : > { %v514_v48 = vadd.f32 %v510_v47, %v424_v39  ;;  %v995_v49 = vpop.f32.mrb[3].mxu0  ;;  %v598_v50 = vpop.f32.mrb[2].mxu1 }
 0x190   : > { %v1030_v52 = vpop.f32.mrb[3].mxu1 }
 0x191   : > { %v602_v53 = vadd.f32 %v598_v50, %v514_v48 }
 0x193   : > { %v628_v54 = vadd.f32 %v626_v51, %v602_v53 }
 0x195   : > { %v629_v55 = vmul.f32 0.25, %v628_v54 }
 0x197   : > { %630 = vst [vmem:[%s251_s27] sm:$0xff] %v629_v55 }
 0x198   : > { %1312 = shalt.err (!%p1309_p2)
}
 0x199   : > { %s1313_s23 = scalar_lea.hbm %s1731_s8, 128  ;;  %s1317_s6 = scalar_lea.hbm %s1783_s3, 256 }
 0x19a   : > { %p1314_p6 = scmp.ne.s32.totalorder %s1731_s8, %s1313_s23  ;;  %p1318_p8 = scmp.lt.u32.totalorder %s1731_s8, %s1783_s3 }
 0x19b   : > { %p1319_p5 = scmp.lt.u32.totalorder %s1317_s6, %s1313_s23  ;;  %p1321_p10 = scmp.lt.u32.totalorder %s1313_s23, %s1731_s8 }
 0x19c   : > { %p1315_p12 = pnand %p1314_p6, %p1802_p13 }
 0x19d   : > { %p1320_p11 = por %p1319_p5, %p1318_p8 }
 0x19e   : > { %p1316_p9 = pneg %p1315_p12 }
 0x19f   : > { %p1322_p0 = por %p1321_p10, %p1320_p11 }
 0x1a1   : > { %p1323_p7 = pnand %p1322_p0, %p1316_p9 }
 0x1a3   : > { %1326 = shalt.err (!%p1323_p7)
}
 0x1a4   : > { %1135 = dma.vmem_to_hbm [thread:$0]  (%p1802_p13), %s1733_s19, 128, %s1731_s8, %s632_s22  }
 0x1a5 PF: > { %s657_s7 = sand.u32 1, %s1365_s12   ;;  %p1803_p4 = scmp.ne.s32.totalorder %s1794_s4, 0 }
 0x1a6   : > { %p1804_p1 = scmp.ge.s32.totalorder %s1385_s17, 2  ;;  %s658_s9 = scalar_lea.sflag [#allocation5], %s657_s7 }
 0x1a8   : > { %p1149_p3 = pnand %p1804_p1, %p1803_p4 }
 0x1aa   : > { %1360 = dma.done.wait (!%p1149_p3), %s658_s9, 128  }
 0x1ab   : > { %1362 = vsyncadd (!%p1149_p3), %s658_s9, 4294967168  ;;  %s20_s17 = sadd.s32 1, %s1385_s17   ;;  %s1805_s12 = smov %s1369_s13 }
 0x1ac   : > { %p17_p2 = scmp.ge.s32.totalorder %s20_s17, 4   ;;  %s1806_s13 = smov %s1373_s14 }
 0x1ad   : > { %s1807_s14 = smov %s1465_s24  ;;  %s1808_s15 = smov %s1381_s16 }
 0x1ae   : > { %s1809_s16 = smov %s1811_s18  ;;  %19 = sbr.rel (!%p17_p2) target bundleno = 9 (0x9), region = 108 }
 0x1b5   :  { %663 = vsyncpa [#allocation4], 1 }
 0x1b6   :  { %665 = vsyncpa [#allocation4 + $0x1], 1 }
 0x1b7   :  { %666 = vsyncpa [#allocation7], 1 }
 0x1b8   :  { %668 = vsyncpa [#allocation7 + $0x1], 1 }
 0x1b9   :  { %669 = vsyncpa [#allocation5], 1 }
 0x1ba   :  { %671 = vsyncpa [#allocation5 + $0x1], 1 }

</bundles_post_ra>
